<compile_context>
chip_gen: v5e
topology: v5e:2x2
jax: 0.10.0
libtpu: 0.0.40
codegen_flags: <defaults>
</compile_context>

<pallas_src>
import math
import numpy as np
import jax
import jax.numpy as jnp
from jax import lax
from jax.experimental import pallas as pl
from jax.experimental.pallas import tpu as pltpu

BN_EPS = 1e-5


# ---------------------------------------------------------------------------
# Hardware-aware sizing helpers
# ---------------------------------------------------------------------------
def _vmem_config():
    """Per-chip scoped-VMEM limit and per-step tile design budget (bytes)."""
    cap = 64 * 1024 * 1024                      # conservative default (v7x physical)
    try:
        info = pltpu.get_tpu_info()
        cap = int(getattr(info, "vmem_capacity_bytes", cap) or cap)
    except Exception:
        pass
    limit = min((cap * 3) // 4, 96 * 1024 * 1024)   # v5e/v6e -> 96 MiB, v7x -> 48 MiB
    limit = max(limit, 16 * 1024 * 1024)
    budget = (limit * 3) // 5                        # leave headroom for Mosaic temps
    return int(limit), int(budget)


def _pick_out_layout(out_size):
    """Factor the per-image out_size*out_size output into a lane-dense (P, L) slab."""
    if out_size % 128 == 0:
        return out_size, out_size               # already lane-dense, no in-kernel reshape
    tot = out_size * out_size
    if tot % 128 == 0:
        return tot // 128, 128                  # unmasked vst: lane dim multiple of 128
    return out_size, out_size                   # fallback (masked stores, still legal)


def _choose_batch_block(B, N, E, H, W, OUT, budget):
    """Largest batch-group size whose per-step VMEM footprint fits the budget."""
    const_b = 2 * (E * E * 2) + 2 * (W * OUT + OUT * H) * 4 + 8 * E * 4 + 4096

    def step_bytes(bb):
        x_b = 2 * bb * N * E * 2                        # double-buffered bf16 input tile
        act_b = int(2.5 * bb * N * E * 4)               # f32 conv1 activation + temps
        out_b = 3 * bb * OUT * OUT * 4                  # out value + double-buffered slab
        mid_b = bb * (2 * H * OUT + N) * 4              # t1, broadcast A, z
        return const_b + x_b + act_b + out_b + mid_b

    # Cap so the grid has >= 2 steps when B >= 2 (both v7x TensorCores get work).
    cap = B if B < 2 else max(1, (B + 1) // 2)
    bb_max = 1
    for cand in range(1, cap + 1):
        if step_bytes(cand) <= budget:
            bb_max = cand
        else:
            break
    # Prefer an exact divisor of B close to bb_max (avoids padded / wasted work).
    for d in range(bb_max, 0, -1):
        if B % d == 0:
            if 4 * d >= 3 * bb_max:
                return d
            break
    return bb_max


def _bilinear_matrix(in_size: int, out_size: int) -> np.ndarray:
    """Interpolation matrix for nn.Upsample(mode='bilinear', align_corners=True)."""
    A = np.zeros((out_size, in_size), dtype=np.float32)
    if in_size == 1 or out_size == 1:
        A[:, 0] = 1.0
        return A
    scale = (in_size - 1) / (out_size - 1)
    for o in range(out_size):
        src = o * scale
        i0 = min(int(math.floor(src)), in_size - 1)
        i1 = min(i0 + 1, in_size - 1)
        w = src - i0
        A[o, i0] += 1.0 - w
        A[o, i1] += w
    return A


# ---------------------------------------------------------------------------
# Pass 1: per-batch-group partial BatchNorm statistics of the conv1 output.
#   x_ref     : (bb, N, E)  bf16
#   w1_ref    : (E, E)      bf16   conv1 weight (in, out)
#   b1_ref    : (1, E)      f32    conv1 bias
#   stats_ref : (1, 2, E)   f32    per-group [sum(y); sum(y*y)]  (single store)
# ---------------------------------------------------------------------------
def _make_stats_kernel(b_real, needs_mask):
    def kernel(x_ref, w1_ref, b1_ref, stats_ref):
        bb, n, e = x_ref.shape
        x = x_ref[...].reshape(bb * n, e)
        y = jnp.dot(x, w1_ref[...], preferred_element_type=jnp.float32) + b1_ref[...]
        if needs_mask:
            # zero-out padded batch rows so they do not pollute the statistics
            row_b = lax.broadcasted_iota(jnp.int32, (bb * n, 1), 0) // n
            valid = (row_b + pl.program_id(0) * bb) < b_real
            y = jnp.where(valid, y, 0.0)
        s = jnp.sum(y, axis=0, keepdims=True)           # (1, E)
        ss = jnp.sum(y * y, axis=0, keepdims=True)      # (1, E)
        stats_ref[...] = jnp.concatenate([s, ss], axis=0)[None]   # one full-block write
    return kernel


# ---------------------------------------------------------------------------
# Pass 2: conv1 + BN(folded) + ReLU + conv2 (VPU) + bilinear upsample, fused.
#   output: (bb, P, L) lane-dense slab with P*L == OUT*OUT
# ---------------------------------------------------------------------------
def _make_apply_kernel(H, W, OUT, P, L):
    def kernel(x_ref, w1_ref, scale_ref, shift_ref, w2_ref, b2_ref,
               awt_ref, ah_ref, o_ref):
        bb, n, e = x_ref.shape

        # conv1 (1x1) as a channel matmul: bf16 inputs, f32 accumulation on the MXU.
        x = x_ref[...].reshape(bb * n, e)
        y = jnp.dot(x, w1_ref[...], preferred_element_type=jnp.float32)
        # folded BatchNorm (train-mode batch stats, conv1 bias folded in) + ReLU
        y = jnp.maximum(y * scale_ref[...] + shift_ref[...], 0.0)

        # conv2 (E -> 1) on the VPU/XLU: per-pixel dot with the w2 row vector.
        y3 = y.reshape(bb * H, W, e)                                   # major-dim split
        z = jnp.sum(y3 * w2_ref[...].reshape(1, 1, e), axis=-1) + b2_ref[...]  # (bb*H, W)

        # Bilinear upsample (align_corners=True) as two interpolation matmuls.
        # stage 1: one flat lane-dense matmul against the pre-transposed (W, OUT) matrix
        t1 = jnp.dot(z, awt_ref[...], preferred_element_type=jnp.float32)     # (bb*H, OUT)
        # stage 2: one batched contraction over H (no per-batch Python loop)
        t1b = t1.reshape(bb, H, OUT)
        ah = jnp.broadcast_to(ah_ref[...][None, :, :], (bb, OUT, H))
        out3 = lax.dot_general(ah, t1b, (((2,), (1,)), ((0,), (0,))),
                               preferred_element_type=jnp.float32)            # (bb, OUT, OUT)

        # single lane-dense store
        o_ref[...] = out3.reshape(bb, P, L)
    return kernel


# ---------------------------------------------------------------------------
# Parameters / wrapper
# ---------------------------------------------------------------------------
def init_params(key, embedding_dim: int):
    """Deterministic synthetic parameters (shapes follow the module's __init__)."""
    k1, k2, k3, k4 = jax.random.split(key, 4)
    E = embedding_dim
    w1 = jax.random.normal(k1, (E, E), jnp.float32) * (1.0 / math.sqrt(E))
    b1 = jax.random.normal(k2, (E,), jnp.float32) * 0.1
    gamma = jnp.ones((E,), jnp.float32)       # BatchNorm2d default init
    beta = jnp.zeros((E,), jnp.float32)
    w2 = jax.random.normal(k3, (1, E), jnp.float32) * (1.0 / math.sqrt(E))
    b2 = jax.random.normal(k4, (1,), jnp.float32) * 0.1
    return dict(w1=w1, b1=b1, gamma=gamma, beta=beta, w2=w2, b2=b2)


def transfusion_decoder_forward(x, params, *, img_dim: int, patch_dim: int,
                                embedding_dim: int):
    B, N, E = x.shape
    H = img_dim // patch_dim
    W = H
    assert N == H * W and E == embedding_dim
    OUT = img_dim
    P, L = _pick_out_layout(OUT)

    vmem_limit, vmem_budget = _vmem_config()
    bb = _choose_batch_block(B, N, E, H, W, OUT, vmem_budget)
    num_groups = -(-B // bb)
    B_pad = num_groups * bb

    # ---- parameter / input prep (bf16 for the dominant conv1 matmul)
    x_bf = x.astype(jnp.bfloat16)                               # (B, N, E)
    if B_pad != B:
        x_bf = jnp.pad(x_bf, ((0, B_pad - B), (0, 0), (0, 0)))
    w1 = params["w1"].T.astype(jnp.bfloat16)                    # (E_in, E_out)
    b1 = params["b1"].reshape(1, E).astype(jnp.float32)
    gamma = params["gamma"].astype(jnp.float32)                 # (E,)
    beta = params["beta"].astype(jnp.float32)                   # (E,)
    w2row = params["w2"].reshape(1, E).astype(jnp.float32)      # (1, E)
    b2 = params["b2"].reshape(1, 1).astype(jnp.float32)         # (1, 1)
    a_h = jnp.asarray(_bilinear_matrix(H, OUT))                 # (OUT, H)  rows / stage 2
    a_w_t = jnp.asarray(_bilinear_matrix(W, OUT).T)             # (W, OUT)  cols / stage 1

    cparams = pltpu.CompilerParams(dimension_semantics=("parallel",),
                                   vmem_limit_bytes=vmem_limit)
    c2 = lambda t: (0, 0)   # constant (resident) 2-D blocks

    # ---- pass 1: per-group partial per-channel sum / sum-of-squares of conv1 output
    stats_kernel = _make_stats_kernel(B, B_pad != B)
    partial = pl.pallas_call(
        stats_kernel,
        out_shape=jax.ShapeDtypeStruct((num_groups, 2, E), jnp.float32),
        grid=(num_groups,),
        in_specs=[
            pl.BlockSpec((bb, N, E), lambda t: (t, 0, 0)),
            pl.BlockSpec((E, E), c2),
            pl.BlockSpec((1, E), c2),
        ],
        out_specs=pl.BlockSpec((1, 2, E), lambda t: (t, 0, 0)),
        compiler_params=cparams,
    )(x_bf, w1, b1)

    # fold BN (train-mode batch stats) + conv1 bias into (scale, shift) in plain XLA
    stats = jnp.sum(partial, axis=0)                            # (2, E)
    count = float(B * N)
    mean = stats[0] / count
    var = jnp.maximum(stats[1] / count - mean * mean, 0.0)      # guard cancellation
    scale_v = gamma * lax.rsqrt(var + BN_EPS)                   # (E,)
    shift_v = (params["b1"].astype(jnp.float32) - mean) * scale_v + beta
    scale = scale_v.reshape(1, E)
    shift = shift_v.reshape(1, E)

    # ---- pass 2: conv1 + BN apply + ReLU + conv2 + bilinear upsample, fused
    apply_kernel = _make_apply_kernel(H, W, OUT, P, L)
    out_flat = pl.pallas_call(
        apply_kernel,
        out_shape=jax.ShapeDtypeStruct((B_pad, P, L), jnp.float32),
        grid=(num_groups,),
        in_specs=[
            pl.BlockSpec((bb, N, E), lambda t: (t, 0, 0)),
            pl.BlockSpec((E, E), c2),
            pl.BlockSpec((1, E), c2),
            pl.BlockSpec((1, E), c2),
            pl.BlockSpec((1, E), c2),
            pl.BlockSpec((1, 1), c2),
            pl.BlockSpec((W, OUT), c2),
            pl.BlockSpec((OUT, H), c2),
        ],
        out_specs=pl.BlockSpec((bb, P, L), lambda t: (t, 0, 0)),
        compiler_params=cparams,
    )(x_bf, w1, scale, shift, w2row, b2, a_w_t, a_h)

    # NCHW output, channel dim = 1, matching PyTorch
    return out_flat[:B].reshape(B, 1, OUT, OUT)


# ---------------------------------------------------------------------------
# Pure-JAX reference (same math, bf16-matched inputs) for a sanity check.
# ---------------------------------------------------------------------------
def _reference(x, params, *, img_dim, patch_dim, embedding_dim):
    B, N, E = x.shape
    H = img_dim // patch_dim
    xq = x.astype(jnp.bfloat16).astype(jnp.float32).reshape(B * N, E)
    w1q = params["w1"].T.astype(jnp.bfloat16).astype(jnp.float32)
    y = xq @ w1q + params["b1"][None, :]
    mean = jnp.mean(y, axis=0, keepdims=True)
    var = jnp.mean(y * y, axis=0, keepdims=True) - mean * mean
    y = (y - mean) * lax.rsqrt(var + BN_EPS)
    y = y * params["gamma"][None, :] + params["beta"][None, :]
    y = jnp.maximum(y, 0.0)
    z = y @ params["w2"].T + params["b2"][None, :]
    z = z.reshape(B, H, H)
    A = jnp.asarray(_bilinear_matrix(H, img_dim))
    out = jnp.einsum("oh,bhw,pw->bop", A, z, A)
    return out.reshape(B, 1, img_dim, img_dim)


if __name__ == "__main__":
    # small shapes consistent with the module
    img_dim = 16
    patch_dim = 4
    embedding_dim = 32
    B = 2
    H = img_dim // patch_dim
    N = H * H

    key = jax.random.PRNGKey(0)
    kx, kp = jax.random.split(key)
    x = jax.random.normal(kx, (B, N, embedding_dim), jnp.float32)
    params = init_params(kp, embedding_dim)

    out = transfusion_decoder_forward(
        x, params, img_dim=img_dim, patch_dim=patch_dim, embedding_dim=embedding_dim
    )
    out = jax.block_until_ready(out)

    ref = _reference(
        x, params, img_dim=img_dim, patch_dim=patch_dim, embedding_dim=embedding_dim
    )
    assert out.shape == (B, 1, img_dim, img_dim), out.shape
    assert np.allclose(np.asarray(out), np.asarray(ref), atol=1e-3, rtol=1e-3)

    print("KERNEL_OK")
</pallas_src>

<mosaic_0001>
module attributes {stable_mosaic.version = 11 : i64} {
  func.func @kernel(%arg0: i32, %arg1: memref<1x16x32xbf16, #tpu.memory_space<vmem>>, %arg2: memref<32x32xbf16, #tpu.memory_space<vmem>>, %arg3: memref<1x32xf32, #tpu.memory_space<vmem>>, %arg4: memref<1x2x32xf32, #tpu.memory_space<vmem>>) attributes {dimension_semantics = [#tpu.dimension_semantics<parallel>], iteration_bounds = array<i64: 2>, scalar_prefetch = 0 : i64, scratch_operands = 0 : i64, tpu.core_type = #tpu.core_type<tc>, window_params = [{transform_indices = @transform_0, window_bounds = array<i64: 1, 16, 32>}, {pipeline_mode = #tpu.pipeline_mode<synchronous>, transform_indices = @transform_1, window_bounds = array<i64: 32, 32>}, {pipeline_mode = #tpu.pipeline_mode<synchronous>, transform_indices = @transform_2, window_bounds = array<i64: 1, 32>}, {transform_indices = @transform_3, window_bounds = array<i64: 1, 2, 32>}]} {
    %c0 = arith.constant 0 : index
    %c0_0 = arith.constant 0 : index
    %c0_1 = arith.constant 0 : index
    %0 = vector.load %arg1[%c0, %c0_0, %c0_1] : memref<1x16x32xbf16, #tpu.memory_space<vmem>>, vector<1x16x32xbf16>
    %1 = vector.shape_cast %0 : vector<1x16x32xbf16> to vector<16x32xbf16>
    %c0_2 = arith.constant 0 : index
    %c0_3 = arith.constant 0 : index
    %2 = vector.load %arg2[%c0_2, %c0_3] : memref<32x32xbf16, #tpu.memory_space<vmem>>, vector<32x32xbf16>
    %cst = arith.constant dense<0.000000e+00> : vector<16x32xf32>
    %3 = tpu.matmul %1, %2, %cst {dimension_numbers = #tpu.dot_dimension_numbers<[1], [0], [0], [1], [0, 0, 1, 1], [], []>} : vector<16x32xbf16>, vector<32x32xbf16>, vector<16x32xf32> -> vector<16x32xf32>
    %c0_4 = arith.constant 0 : index
    %c0_5 = arith.constant 0 : index
    %4 = vector.load %arg3[%c0_4, %c0_5] : memref<1x32xf32, #tpu.memory_space<vmem>>, vector<1x32xf32>
    %5 = vector.broadcast %4 : vector<1x32xf32> to vector<16x32xf32>
    %6 = arith.addf %3, %5 : vector<16x32xf32>
    %cst_6 = arith.constant dense<0.000000e+00> : vector<32xf32>
    %7 = vector.multi_reduction <add>, %6, %cst_6 [0] : vector<16x32xf32> to vector<32xf32>
    %8 = vector.shape_cast %7 : vector<32xf32> to vector<1x32xf32>
    %9 = arith.mulf %6, %6 : vector<16x32xf32>
    %cst_7 = arith.constant dense<0.000000e+00> : vector<32xf32>
    %10 = vector.multi_reduction <add>, %9, %cst_7 [0] : vector<16x32xf32> to vector<32xf32>
    %11 = vector.shape_cast %10 : vector<32xf32> to vector<1x32xf32>
    %12 = tpu.concatenate %8, %11 in 0 : vector<1x32xf32>, vector<1x32xf32> -> vector<2x32xf32>
    %13 = vector.shape_cast %12 : vector<2x32xf32> to vector<1x2x32xf32>
    %c0_8 = arith.constant 0 : index
    %c0_9 = arith.constant 0 : index
    %c0_10 = arith.constant 0 : index
    %14 = vector.load %arg4[%c0_8, %c0_9, %c0_10] : memref<1x2x32xf32, #tpu.memory_space<vmem>>, vector<1x2x32xf32>
    tpu.vector_store %arg4[%c0_8, %c0_9, %c0_10], %13 {strides = array<i32>} : memref<1x2x32xf32, #tpu.memory_space<vmem>>, vector<1x2x32xf32>,
    return
  }
  func.func @transform_0(%arg0: i32) -> (i32, i32, i32) {
    %c0_i32 = arith.constant 0 : i32
    %c0_i32_0 = arith.constant 0 : i32
    %c0_i32_1 = arith.constant 0 : i32
    return %arg0, %c0_i32, %c0_i32_0 : i32, i32, i32
  }
  func.func @transform_1(%arg0: i32) -> (i32, i32) {
    %c0_i32 = arith.constant 0 : i32
    %c0_i32_0 = arith.constant 0 : i32
    %c0_i32_1 = arith.constant 0 : i32
    return %c0_i32, %c0_i32_0 : i32, i32
  }
  func.func @transform_2(%arg0: i32) -> (i32, i32) {
    %c0_i32 = arith.constant 0 : i32
    %c0_i32_0 = arith.constant 0 : i32
    %c0_i32_1 = arith.constant 0 : i32
    return %c0_i32, %c0_i32_0 : i32, i32
  }
  func.func @transform_3(%arg0: i32) -> (i32, i32, i32) {
    %c0_i32 = arith.constant 0 : i32
    %c0_i32_0 = arith.constant 0 : i32
    %c0_i32_1 = arith.constant 0 : i32
    return %arg0, %c0_i32, %c0_i32_0 : i32, i32, i32
  }
}

</mosaic_0001>

<bundles_post_ra>
// kernel: tpu_custom_call.1
= control target key start
LH: loop header
LB: loop body
LE: loop exit
PB: predicated region body
PF: predicated region fallthrough
CT: control target
= control target key end

     0   :  { %8 = vsyncpa [#allocation3], 0  ;;  %s769_s0 = inlined_call_operand.hbm [shape: bf16[2,16,32], index: 0, kind: input, shape index: {}]   ;;  %s770_s1 = inlined_call_operand.hbm [shape: bf16[32,32], index: 1, kind: input, shape index: {}]   ;;  %s771_s2 = inlined_call_operand.vmem [shape: f32[1,32], index: 2, kind: input, shape index: {}]   ;;  %s772_s3 = inlined_call_operand.hbm [shape: f32[2,2,32], index: 3, kind: output, shape index: {}]  }
   0x1   :  { %10 = vsyncpa [#allocation3 + $0x1], 0 }
   0x2   :  { %11 = vsyncpa [#allocation6], 0 }
   0x3   :  { %12 = vsyncpa [#allocation4], 0 }
   0x4   :  { %14 = vsyncpa [#allocation4 + $0x1], 0  ;;  %s621_s12 = smov 0   ;;  %s623_s13 = smov 0  }
   0x5   :  { %s625_s14 = smov 0   ;;  %s627_s15 = smov 0  }
   0x6 LB: > { %s642_s16 = sadd.s32 4294967295, %s596_s15   ;;  %s374_s17 = sadd.s32 4294967294, %s596_s15   ;;  %s596_s15 = sphi %s627_s15, %s782_s15   ;;  %s592_s14 = sphi %s625_s14, %s781_s14   ;;  %s588_s13 = sphi %s623_s13, %s780_s13   ;;  %s584_s12 = sphi %s621_s12, %s779_s12  }
   0x7   : > { %p40_p0 = scmp.ne.s32.totalorder %s588_s13, %s584_s12  ;;  %p41_p1 = scmp.eq.s32.totalorder %s642_s16, 0 }
   0x8   : > { %p106_p2 = scmp.eq.s32.totalorder %s642_s16, 1  ;;  %p112_p3 = scmp.eq.s32.totalorder %s374_s17, 1 }
   0x9   : > { %p651_p4 = por %p41_p1, %p40_p0  ;;  %p375_p5 = scmp.ge.s32.totalorder %s596_s15, 1 }
   0xa   : > { %p656_p6 = por %p112_p3, %p40_p0  ;;  %p119_p7 = scmp.lt.s32.totalorder %s596_s15, 3 }
   0xb   : > { %s130_s22 = sshll.u32 %s770_s1, 4  ;;  %s598_s24 = smov [#allocation5]   ;;  %s131_s22 = int_to_ptr.hbm [resolvable:$true] %s130_s22 }
   0xc   : > { %p664_p8 = pnand %p375_p5, %p119_p7  ;;  %s132_s25 = sshll.u32 %s598_s24, 4  ;;  %s133_s25 = int_to_ptr.vmem [resolvable:$true] %s132_s25 }
   0xd   : > { %s674_s26 = sadd.s32 1, %s596_s15   ;;  %s599_s27 = smov 64  }
   0xe   : > { %p414_p9 = pneg %p664_p8  ;;  %s600_s28 = smov 4  }
   0xf   : > { %s24_s29 = ssub.s32 %s596_s15, %s674_s26  ;;  %s27_s30 = sadd.s32 1, %s592_s14 }
  0x10   : > { %p415_p10 = pnand %p414_p9, %p41_p1  ;;  %p25_p12 = scmp.eq.s32.totalorder %s24_s29, 0 }
  0x11   : > { %p34_p13 = scmp.ne.s32.totalorder %s592_s14, %s588_s13  ;;  %p35_p0 = scmp.eq.s32.totalorder %s596_s15, 0 }
  0x12   : > { %417 = dma.hbm_to_vmem [thread:$0]  (!%p415_p10), %s131_s22, 256, %s133_s25, [#allocation6], %s599_s27, %s599_s27, %s600_s28  }
  0x13   : > { %s686_s4 = scalar_select %p25_p12, %s592_s14, %s27_s30  }
  0x14   : > { %p690_p3 = por %p106_p2, %p34_p13  ;;  %p427_p5 = scmp.lt.s32.totalorder %s596_s15, 2 }
  0x15   : > { %s149_s6 = sand.u32 1, %s592_s14   ;;  %s402_s7 = sshll.u32 %s596_s15, 3 }
  0x16   : > { %p36_p7 = por %p35_p0, %p34_p13  ;;  %s378_s8 = sshll.u32 %s149_s6, 3 }
  0x17   : > { %s158_s11 = scalar_lea.hbm %s769_s0, %s402_s7  ;;  %s153_s20 = scalar_lea.vmem [#allocation2], %s378_s8 }
  0x18   : > { %s159_s17 = sshll.u32 %s158_s11, 4  ;;  %s161_s21 = sshll.u32 %s153_s20, 4  ;;  %s160_s17 = int_to_ptr.hbm [resolvable:$true] %s159_s17  ;;  %s162_s21 = int_to_ptr.vmem [resolvable:$true] %s161_s21 }
  0x19   : > { %p700_p9 = pnand %p427_p5, %p36_p7  ;;  %s150_s24 = scalar_lea.sflag [#allocation3], %s149_s6 }
  0x1a   : > { %s496_s25 = sshra.s32 %s160_s17, 4  ;;  %s503_s8 = scalar_lea.hbm %s769_s0, 16  ;;  %s497_s25 = int_to_ptr.hbm [resolvable:$true] %s496_s25 }
  0x1b   : > { %s498_s29 = scalar_lea.hbm %s497_s25, 8  ;;  %p500_p10 = pneg %p700_p9 }
  0x1c   : > { %p499_p2 = scmp.ne.s32.totalorder %s497_s25, %s498_s29  ;;  %p504_p0 = scmp.lt.s32.totalorder %s497_s25, %s769_s0 }
  0x1d   : > { %p505_p5 = scmp.lt.s32.totalorder %s503_s8, %s498_s29 }
  0x1e   : > { %p501_p12 = pnand %p500_p10, %p499_p2 }
  0x1f   : > { %p506_p7 = por %p505_p5, %p504_p0 }
  0x20   : > { %p502_p13 = pneg %p501_p12 }
  0x22   : > { %p507_p11 = pnand %p506_p7, %p502_p13 }
  0x24   : > { %510 = shalt.err (!%p507_p11)
}
  0x25   : > { %421 = dma.hbm_to_vmem [thread:$0]  (!%p700_p9), %s160_s17, 128, %s162_s21, %s150_s24, %s599_s27, %s599_s27, %s600_s28  }
  0x26   : > { %173 = sbr.rel (%p664_p8) target bundleno = 211 (0xd3), region = 32  ;;  %s720_s6 = sand.u32 (!%p664_p8), 1, %s588_s13  }
  0x27   : > { %s382_s11 = sshll.u32 (!%p664_p8), %s720_s6, 3  ;;  %s176_s20 = scalar_lea.sflag (!%p664_p8), [#allocation3], %s720_s6 }
  0x28   : > { %s179_s25 = scalar_lea.vmem (!%p664_p8), [#allocation2], %s382_s11 }
  0x2b   : > { %571 = dma.done.wait (%p651_p4), %s176_s20, 128  }
  0x2c   : > { %573 = vsyncadd (%p651_p4), %s176_s20, 4294967168 }
  0x2d   : > { %575 = dma.done.wait (%p41_p1), [#allocation6], 256  }
  0x2e   : > { %577 = vsyncadd (%p41_p1), [#allocation6], 4294967040  ;;  %v405_v0 = vld [vmem:[#allocation5 + $0x8] sm:$0xff]  ;;  %v404_v1 = vld [vmem:[#allocation5] sm:$0xff]  ;;  %vm236_vm0 = vcmask 261120   ;;  %s384_s18 = sshll.u32 %s720_s6, 1 }
  0x2f   : > { %246 = vmatpush.bf16.msra.mxu0 %v405_v0  ;;  %v403_v2 = vld [vmem:[%s179_s25] sm:$0xff]  ;;  %s399_s28 = sshll.u32 %s642_s16, 1  ;;  %s207_s24 = scalar_lea.vmem [#allocation7], %s384_s18  ;;  %vm274_vm1 = vcmask 1040384   ;;  %vm276_vm2 = vcmask 254976  }
  0x30   : > { %v465_v4 = vld [vmem:[%s771_s2] ss:$0 sm:$0xff]  ;;  %s289_s22 = scalar_lea.hbm %s772_s3, %s399_s28  ;;  %s291_s29 = sshll.u32 %s207_s24, 4  ;;  %s292_s29 = int_to_ptr.vmem [resolvable:$true] %s291_s29 }
  0x31   : > { %s293_s30 = sshll.u32 %s289_s22, 4  ;;  %s279_s16 = scalar_lea.sflag [#allocation4], %s720_s6  ;;  %s294_s30 = int_to_ptr.hbm [resolvable:$true] %s293_s30 }
  0x32   : > { %s540_s7 = sshra.s32 %s294_s30, 4  ;;  %s546_s11 = scalar_lea.hbm %s772_s3, 4  ;;  %s541_s7 = int_to_ptr.hbm [resolvable:$true] %s540_s7 }
  0x33   : > { %247 = vmatpush.bf16.msra.mxu0 %v404_v1  ;;  %s542_s8 = scalar_lea.hbm %s541_s7, 2  ;;  %p547_p11 = scmp.lt.s32.totalorder %s541_s7, %s772_s3 }
  0x34   : > { %p543_p1 = scmp.ne.s32.totalorder %s541_s7, %s542_s8  ;;  %p548_p9 = scmp.lt.s32.totalorder %s546_s11, %s542_s8 }
  0x36   : > { %397 = vmatmul.msk.bf16.vlgmr.msra.gmra.mxu0 %vm236_vm0, %v403_v2  ;;  %p544_p4 = pnand %p543_p1, %p690_p3  ;;  %p549_p2 = por %p548_p9, %p547_p11 }
  0x38   : > { %p545_p8 = pneg %p544_p4 }
  0x3a   : > { %p550_p10 = pnand %p549_p2, %p545_p8 }
  0xb3   : > { %v249_v3 = vpop.f32.mrf.mxu0 }
  0xb4   : > { %v250_v5 = vadd.f32 %v465_v4, %v249_v3 }
  0xb6   : > { %v263_v7 = vmul.f32 %v250_v5, %v250_v5  ;;  %v254_v9 = vsel %vm236_vm0, %v250_v5, 0.0 }
  0xb8   : > { %v265_v13 = vsel %vm236_vm0, %v263_v7, 0.0 }
  0xbb   : > { %v251_v6 = vpop.f32.mrf.mxu0 }
  0xbc   : > { %v252_v8 = vadd.f32 %v465_v4, %v251_v6 }
  0xbe   : > { %v255_v10 = vsel %vm236_vm0, %v252_v8, 0.0  ;;  %v264_v11 = vmul.f32 %v252_v8, %v252_v8 }
  0xbf   : > { %v256_v12 = vadd.f32 %v255_v10, %v254_v9 }
  0xc0   : > { %v266_v14 = vsel %vm236_vm0, %v264_v11, 0.0 }
  0xc1   : > { %v257_v15 = vrot.slane %v256_v12, 4  ;;  %v267_v16 = vadd.f32 %v266_v14, %v265_v13 }
  0xc3   : > { %v258_v17 = vadd.f32 %v257_v15, %v256_v12  ;;  %v268_v18 = vrot.slane %v267_v16, 4 }
  0xc5   : > { %v259_v19 = vrot.slane %v258_v17, 2  ;;  %v269_v20 = vadd.f32 %v268_v18, %v267_v16 }
  0xc7   : > { %v260_v21 = vadd.f32 %v259_v19, %v258_v17  ;;  %v270_v22 = vrot.slane %v269_v20, 2 }
  0xc9   : > { %v261_v23 = vrot.slane %v260_v21, 1  ;;  %v271_v24 = vadd.f32 %v270_v22, %v269_v20 }
  0xcb   : > { %v272_v25 = vrot.slane %v271_v24, 1  ;;  %v262_v26 = vadd.f32 %v261_v23, %v260_v21 }
  0xcd   : > { %v273_v27 = vadd.f32 %v272_v25, %v271_v24 }
  0xcf   : > { %v275_v28 = vsel %vm274_vm1, %v262_v26, %v273_v27 }
  0xd0   : > { %277 = vst.msk [vmem:[%s207_s24] sm:$0x3] %vm276_vm2, %v275_v28 }
  0xd1   : > { %553 = shalt.err (!%p550_p10)
}
  0xd2   : > { %412 = dma.vmem_to_hbm [thread:$0]  (%p690_p3), %s292_s29, 32, %s294_s30, %s279_s16  }
  0xd3 PF: > { %s305_s6 = sand.u32 1, %s584_s12   ;;  %p778_p12 = scmp.ge.s32.totalorder %s596_s15, 2 }
  0xd4   : > { %s306_s23 = scalar_lea.sflag [#allocation4], %s305_s6 }
  0xd5   : > { %p423_p13 = pnand %p778_p12, %p656_p6 }
  0xd7   : > { %p424_p0 = pneg %p423_p13 }
  0xd9   : > { %579 = dma.done.wait (%p424_p0), %s306_s23, 32  }
  0xda   : > { %581 = vsyncadd (%p424_p0), %s306_s23, 4294967264  ;;  %p17_p5 = scmp.ge.s32.totalorder %s674_s26, 4   ;;  %s779_s12 = smov %s588_s13 }
  0xdb   : > { %s780_s13 = smov %s592_s14  ;;  %s781_s14 = smov %s686_s4 }
  0xdc   : > { %s782_s15 = smov %s674_s26  ;;  %19 = sbr.rel (!%p17_p5) target bundleno = 6 (0x6), region = 81 }
  0xe1   :  { %312 = vsyncpa [#allocation3], 1 }
  0xe2   :  { %314 = vsyncpa [#allocation3 + $0x1], 1 }
  0xe3   :  { %315 = vsyncpa [#allocation6], 1 }
  0xe4   :  { %316 = vsyncpa [#allocation4], 1 }
  0xe5   :  { %318 = vsyncpa [#allocation4 + $0x1], 1 }

</bundles_post_ra>
